<compile_context>
chip_gen: v6e
topology: v6e:2x2x1
jax: 0.10.0
libtpu: 0.0.40
codegen_flags: <defaults>
</compile_context>

<pallas_src>
import jax
import jax.numpy as jnp
from jax.experimental import pallas as pl
from jax.experimental.pallas import tpu as pltpu


def _round_up(x, m):
    return ((x + m - 1) // m) * m


def _round_down(x, m):
    return (x // m) * m


def _vmem_capacity_bytes():
    try:
        info = pltpu.get_tpu_info()
        cap = getattr(info, "vmem_capacity_bytes", None)
        if cap:
            return int(cap)
    except Exception:
        pass
    return 64 * 1024 * 1024  # conservative fallback: v7x per-TC VMEM


def _pgd_kernel(x_ref, w_ref, out_ref):
    # x_ref:   (tile_n, d)      X sample tile (resident across the inner dag axis)
    # w_ref:   (1, d, N)        fused (dags * W) weight slab for this dag block
    # out_ref: (1, tile_n, N)   lane-dense output slab (N = B*d, or d when B == 1)
    out_ref[0] = jnp.dot(
        x_ref[...], w_ref[0], preferred_element_type=jnp.float32
    ).astype(out_ref.dtype)


def parametric_gd_fitting_forward(
    X,
    dags,
    W,
    l2_reg_strength,
    *,
    tile_n=None,
    dags_per_step=None,
    use_bf16_mxu=False,
    out_dtype=None,
):
    """Returns (x_hat, dags, regularizer) exactly like ParametricGDFitting.forward."""
    n, d = X.shape
    o = dags.shape[0]
    out_dtype = jnp.dtype(out_dtype) if out_dtype is not None else jnp.dtype(X.dtype)

    # --- regularizer(): tiny reduction, plain XLA (always on the f32 master weights) --
    reg = l2_reg_strength * jnp.mean(W.astype(jnp.float32) ** 2, axis=(1, 2))

    # --- fuse the dag mask into the weights in the wrapper (exact identity) -----------
    w_eff = (dags * W).astype(jnp.float32)

    # --- optional bf16 feed to the MXU: cast ONCE here, not per grid step -------------
    if use_bf16_mxu:
        Xk = X.astype(jnp.bfloat16)
        w_eff = w_eff.astype(jnp.bfloat16)
    else:
        Xk = X

    x_item = jnp.dtype(Xk.dtype).itemsize
    w_item = jnp.dtype(w_eff.dtype).itemsize
    o_item = out_dtype.itemsize
    sublane = 16 if min(x_item, o_item) == 2 else 8

    # --- dag batching ------------------------------------------------------------------
    # d >= 128: already lane-dense, write directly into (o, n, d) -> no un-slab pass.
    # d < 128:  batch B dags into one (d, B*d) slab, targeting 256 lanes (v6e/v7x MXU).
    if dags_per_step is not None:
        B = max(1, int(dags_per_step))
    elif d >= 128:
        B = 1
    else:
        B = max(1, -(-256 // d))  # ceil(256 / d)
    B = min(B, o)
    N = B * d
    o_pad = _round_up(o, B)
    n_dag_blocks = o_pad // B

    # --- tile_n from a generation-aware VMEM budget (double-buffered working set) ------
    vmem_cap = _vmem_capacity_bytes()
    budget = vmem_cap // 2  # headroom for compiler scratch / pipeline internals
    denom = 2 * (d * x_item + N * o_item)
    avail = budget - 2 * d * N * w_item
    tile_cap = max(sublane, avail // denom) if avail > 0 else sublane
    if tile_n is None:
        tile_n = min(int(tile_cap), 2048)
        if tile_n >= 256:
            tile_n = _round_down(tile_n, 256)
    tile_n = max(sublane, _round_down(int(tile_n), sublane))
    tile_n = min(tile_n, _round_up(n, sublane))
    n_pad = _round_up(n, tile_n)

    # --- pad inputs (zero rows / zero dags contribute zeros, sliced off afterwards) ----
    Xp = jnp.pad(Xk, ((0, n_pad - n), (0, 0))) if n_pad != n else Xk
    w_pad = jnp.pad(w_eff, ((0, o_pad - o), (0, 0), (0, 0))) if o_pad != o else w_eff

    # --- slab layout (d < 128 only): (o_pad, d, d) -> (o_pad//B, d, B*d) ----------------
    if B == 1:
        w_slab = w_pad  # direct layout, already (n_dag_blocks, d, N)
    else:
        w_slab = (
            w_pad.reshape(n_dag_blocks, B, d, d)
            .transpose(0, 2, 1, 3)
            .reshape(n_dag_blocks, d, N)
        )

    # --- VMEM limit: never clamp below the double-buffered working set ------------------
    est = 2 * tile_n * d * x_item + 2 * d * N * w_item + 2 * tile_n * N * o_item
    vmem_limit = int(min(vmem_cap, max(est + (8 << 20), 16 << 20)))

    out_slab = pl.pallas_call(
        _pgd_kernel,
        out_shape=jax.ShapeDtypeStruct((n_dag_blocks, n_pad, N), out_dtype),
        grid_spec=pltpu.PrefetchScalarGridSpec(
            num_scalar_prefetch=0,
            # dag axis innermost: X's index_map depends only on the outer axis, so the
            # sample tile is not re-fetched across the inner dag loop.
            grid=(n_pad // tile_n, n_dag_blocks),
            in_specs=[
                pl.BlockSpec((tile_n, d), lambda ni, oi: (ni, 0)),       # X tile
                pl.BlockSpec((1, d, N), lambda ni, oi: (oi, 0, 0)),      # fused weights
            ],
            out_specs=pl.BlockSpec((1, tile_n, N), lambda ni, oi: (oi, ni, 0)),
        ),
        compiler_params=pltpu.CompilerParams(
            dimension_semantics=("parallel", "parallel"),
            vmem_limit_bytes=vmem_limit,
        ),
    )(Xp, w_slab)

    # --- output: direct slice (B == 1) or one un-slab pass (d < 128) --------------------
    if B == 1:
        out = out_slab[:o, :n, :]
    else:
        out = (
            out_slab.reshape(n_dag_blocks, n_pad, B, d)
            .transpose(0, 2, 1, 3)
            .reshape(o_pad, n_pad, d)[:o, :n, :]
        )
    return out, dags, reg


def _reference_forward(X, dags, W, l2_reg_strength):
    # Literal transcription of the PyTorch path (with the linear _forward_impl).
    mx = jnp.einsum('opc,np->oncp', dags, X)                 # masked_x
    out = jnp.einsum('oncp,opc->onc', mx, W)                 # linear _forward_impl
    reg = l2_reg_strength * jnp.mean(W ** 2, axis=(1, 2))    # regularizer()
    return out, dags, reg


def _make_inputs(key, n, d, num_structures):
    kx, kd, kw = jax.random.split(key, 3)
    X = jax.random.normal(kx, (n, d), dtype=jnp.float32)
    dags = (jax.random.uniform(kd, (num_structures, d, d)) < 0.3).astype(jnp.float32)
    dags = dags * (1.0 - jnp.eye(d, dtype=jnp.float32))  # no self-loops
    W = 0.05 * jax.random.normal(kw, (num_structures, d, d), dtype=jnp.float32)
    return X, dags, W


if __name__ == "__main__":
    l2_reg_strength = 0.1
    key = jax.random.PRNGKey(0)
    k1, k2, k3 = jax.random.split(key, 3)

    # A: tiny shapes consistent with the module (d variables, n samples, o dags), slab path.
    # B: non-divisible n and o to exercise sample tiling, dag batching, padding.
    # C: d >= 128 to exercise the direct (no un-slab) output layout.
    configs = [
        (k1, 8, 16, 2, {}),
        (k2, 100, 16, 3, {"tile_n": 32}),
        (k3, 64, 128, 2, {}),
    ]

    for kk, n, d, o, kwargs in configs:
        X, dags, W = _make_inputs(kk, n, d, o)

        x_hat, dags_out, reg = parametric_gd_fitting_forward(
            X, dags, W, l2_reg_strength, **kwargs
        )
        jax.block_until_ready((x_hat, dags_out, reg))

        x_hat_ref, _, reg_ref = _reference_forward(X, dags, W, l2_reg_strength)
        assert x_hat.shape == (o, n, d)
        assert reg.shape == (o,)
        assert jnp.allclose(x_hat, x_hat_ref, atol=1e-5, rtol=1e-5)
        assert jnp.allclose(reg, reg_ref, atol=1e-6, rtol=1e-6)
        assert jnp.array_equal(dags_out, dags)

        # bf16-MXU feed (v6e/v7x peak-throughput option): relaxed tolerance.
        x_hat_bf, _, reg_bf = parametric_gd_fitting_forward(
            X, dags, W, l2_reg_strength, use_bf16_mxu=True, **kwargs
        )
        jax.block_until_ready((x_hat_bf, reg_bf))
        assert jnp.allclose(x_hat_bf, x_hat_ref, atol=2e-2, rtol=2e-2)
        assert jnp.allclose(reg_bf, reg_ref, atol=1e-6, rtol=1e-6)

    # bf16 output stream option (halves the dominant output HBM write).
    X, dags, W = _make_inputs(k3, 64, 128, 2)
    x_hat_ref, _, _ = _reference_forward(X, dags, W, l2_reg_strength)
    x_hat_b16, _, _ = parametric_gd_fitting_forward(
        X, dags, W, l2_reg_strength, use_bf16_mxu=True, out_dtype=jnp.bfloat16
    )
    jax.block_until_ready(x_hat_b16)
    assert x_hat_b16.dtype == jnp.bfloat16
    assert jnp.allclose(x_hat_b16.astype(jnp.float32), x_hat_ref, atol=3e-2, rtol=3e-2)

    print("KERNEL_OK")
</pallas_src>

<mosaic_0001>
module attributes {stable_mosaic.version = 11 : i64} {
  func.func @_pgd_kernel(%arg0: i32, %arg1: i32, %arg2: memref<8x16xf32, #tpu.memory_space<vmem>>, %arg3: memref<1x16x32xf32, #tpu.memory_space<vmem>>, %arg4: memref<1x8x32xf32, #tpu.memory_space<vmem>>) attributes {dimension_semantics = [#tpu.dimension_semantics<parallel>, #tpu.dimension_semantics<parallel>], iteration_bounds = array<i64: 1, 1>, scalar_prefetch = 0 : i64, scratch_operands = 0 : i64, tpu.core_type = #tpu.core_type<tc>, window_params = [{transform_indices = @transform_0, window_bounds = array<i64: 8, 16>}, {transform_indices = @transform_1, window_bounds = array<i64: 1, 16, 32>}, {transform_indices = @transform_2, window_bounds = array<i64: 1, 8, 32>}]} {
    %c0 = arith.constant 0 : index
    %c0_0 = arith.constant 0 : index
    %0 = vector.load %arg2[%c0, %c0_0] : memref<8x16xf32, #tpu.memory_space<vmem>>, vector<8x16xf32>
    %c0_1 = arith.constant 0 : index
    %c0_2 = arith.constant 0 : index
    %c0_3 = arith.constant 0 : index
    %1 = vector.load %arg3[%c0_1, %c0_2, %c0_3] : memref<1x16x32xf32, #tpu.memory_space<vmem>>, vector<1x16x32xf32>
    %2 = vector.shape_cast %1 : vector<1x16x32xf32> to vector<16x32xf32>
    %cst = arith.constant dense<0.000000e+00> : vector<8x32xf32>
    %3 = tpu.matmul %0, %2, %cst {dimension_numbers = #tpu.dot_dimension_numbers<[1], [0], [0], [1], [0, 0, 1, 1], [], []>} : vector<8x16xf32>, vector<16x32xf32>, vector<8x32xf32> -> vector<8x32xf32>
    %c0_4 = arith.constant 0 : index
    %c0_5 = arith.constant 0 : index
    %c0_6 = arith.constant 0 : index
    %4 = vector.load %arg4[%c0_4, %c0_5, %c0_6] : memref<1x8x32xf32, #tpu.memory_space<vmem>>, vector<1x8x32xf32>
    %5 = vector.shape_cast %4 : vector<1x8x32xf32> to vector<8x32xf32>
    %6 = vector.shape_cast %3 : vector<8x32xf32> to vector<1x8x32xf32>
    tpu.vector_store %arg4[%c0_4, %c0_5, %c0_6], %6 {strides = array<i32>} : memref<1x8x32xf32, #tpu.memory_space<vmem>>, vector<1x8x32xf32>,
    return
  }
  func.func @transform_0(%arg0: i32, %arg1: i32) -> (i32, i32) {
    %c0_i32 = arith.constant 0 : i32
    %c0_i32_0 = arith.constant 0 : i32
    return %arg0, %c0_i32 : i32, i32
  }
  func.func @transform_1(%arg0: i32, %arg1: i32) -> (i32, i32, i32) {
    %c0_i32 = arith.constant 0 : i32
    %c0_i32_0 = arith.constant 0 : i32
    %c0_i32_1 = arith.constant 0 : i32
    return %arg1, %c0_i32, %c0_i32_0 : i32, i32, i32
  }
  func.func @transform_2(%arg0: i32, %arg1: i32) -> (i32, i32, i32) {
    %c0_i32 = arith.constant 0 : i32
    %c0_i32_0 = arith.constant 0 : i32
    return %arg1, %arg0, %c0_i32 : i32, i32, i32
  }
}

</mosaic_0001>

<bundles_post_ra>
// kernel: tpu_custom_call.1
= control target key start
LH: loop header
LB: loop body
LE: loop exit
PB: predicated region body
PF: predicated region fallthrough
CT: control target
= control target key end

     0   :  { %7 = vsyncpa [#allocation3], 0  ;;  %s248_s0 = inlined_call_operand.hbm [shape: f32[8,16], index: 0, kind: input, shape index: {}]   ;;  %s249_s1 = inlined_call_operand.hbm [shape: f32[1,16,32], index: 1, kind: input, shape index: {}]   ;;  %s250_s2 = inlined_call_operand.hbm [shape: f32[1,8,32], index: 2, kind: output, shape index: {}]  }
   0x1   :  { %8 = vsyncpa [#allocation6], 0 }
   0x2   :  { %9 = vsyncpa [#allocation4], 0  ;;  %s217_s9 = smov [#allocation2]   ;;  %s218_s11 = smov [#allocation5]  }
   0x3   :  { %s16_s10 = sshll.u32 %s217_s9, 4  ;;  %s25_s12 = sshll.u32 %s218_s11, 4  ;;  %s17_s10 = int_to_ptr.vmem [resolvable:$true] %s16_s10  ;;  %s26_s12 = int_to_ptr.vmem [resolvable:$true] %s25_s12 }
   0x4   :  { %s159_s13 = scalar_lea.vmem %s17_s10, 128  ;;  %p164_p1 = scmp.lt.s32.totalorder %s17_s10, %s17_s10 }
   0x5   :  { %p160_p0 = scmp.ne.s32.totalorder %s17_s10, %s159_s13  ;;  %p165_p2 = scmp.lt.s32.totalorder %s159_s13, %s159_s13 }
   0x7   :  { %p166_p3 = por %p165_p2, %p164_p1 }
   0x9   :  { %p167_p4 = pnand %p166_p3, %p160_p0 }
   0xb   :  { %170 = shalt.err (!%p167_p4)
}
   0xc   :  { %19 = dma.hbm_to_vmem [thread:$0]  %s248_s0, 128, %s17_s10, [#allocation3]  }
   0xd   :  { %s179_s16 = scalar_lea.vmem %s26_s12, 256  ;;  %p184_p6 = scmp.lt.s32.totalorder %s26_s12, %s26_s12 }
   0xe   :  { %p180_p5 = scmp.ne.s32.totalorder %s26_s12, %s179_s16  ;;  %p185_p7 = scmp.lt.s32.totalorder %s179_s16, %s179_s16 }
  0x10   :  { %p186_p8 = por %p185_p7, %p184_p6 }
  0x12   :  { %p187_p9 = pnand %p186_p8, %p180_p5 }
  0x14   :  { %190 = shalt.err (!%p187_p9)
}
  0x15   :  { %s219_s17 = smov 128   ;;  %s220_s18 = smov 8  }
  0x16   :  { %31 = dma.hbm_to_vmem [thread:$0]  %s249_s1, 256, %s26_s12, [#allocation6], %s219_s17, %s219_s17, %s220_s18  }
  0x17   :  { %211 = dma.done.wait [#allocation3], 128  }
  0x18   :  { %212 = vsyncadd [#allocation3], 4294967168 }
  0x19   :  { %213 = dma.done.wait [#allocation6], 256  }
  0x1a   :  { %214 = vsyncadd [#allocation6], 4294967040  ;;  %v221_v0 = vmov 0.0   ;;  %vm222_vm0 = vmmov 0   ;;  %v40_v1 = vld [vmem:[#allocation5 + $0x8] sm:$0xff]  ;;  %v39_v2 = vld [vmem:[#allocation5] sm:$0xff] }
  0x1b   :  { %137 = vmatprep.subr.mxu0 %v221_v0  ;;  %141 = vmatprep.mubr.msk.f32.mxu0 %vm222_vm0, %v221_v0  ;;  %v38_v3 = vld [vmem:[#allocation2] sm:$0xff]  ;;  %vm41_vm1 = vcmask 130048   ;;  %s223_s0 = smov [#allocation7]   ;;  %vm115_vm2 = vcmask 261120  }
  0x1c   :  { %138 = vmatpush3.msra.mxu0 %v40_v1  ;;  %s123_s21 = sshll.u32 %s223_s0, 4  ;;  %s124_s21 = int_to_ptr.vmem [resolvable:$true] %s123_s21 }
  0x1d   :  { %139 = vmatprep.subr.mxu0 %v221_v0  ;;  %s191_s1 = scalar_lea.vmem %s124_s21, 128  ;;  %p196_p11 = scmp.lt.s32.totalorder %s124_s21, %s124_s21 }
  0x1e   :  { %140 = vmatpush3.msra.mxu0 %v39_v2  ;;  %p192_p10 = scmp.ne.s32.totalorder %s124_s21, %s191_s1  ;;  %p197_p12 = scmp.lt.s32.totalorder %s191_s1, %s191_s1 }
  0x1f   :  { %142 = vmatmul.mubr.msk.f32.vlgmr.msra.gmra.mxu0 %vm41_vm1, %v38_v3 }
  0x20   :  { %p198_p13 = por %p197_p12, %p196_p11 }
  0x22   :  { %p199_p0 = pnand %p198_p13, %p192_p10 }
  0xdf   :  { %v111_v4 = vpop.f32.mrf.mxu0 }
  0xe0   :  { %116 = vst.msk [vmem:[#allocation7] sm:$0xff] %vm115_vm2, %v111_v4 }
  0xe1   :  { %v143_v5 = vpop.f32.mrf.mxu0 }
  0xe2   :  { %202 = shalt.err (!%p199_p0)
}
  0xe3   :  { %126 = dma.vmem_to_hbm [thread:$0]  %s124_s21, 128, %s250_s2, [#allocation4]  }
  0xe4   :  { %215 = dma.done.wait [#allocation4], 128  }
  0xe5   :  { %216 = vsyncadd [#allocation4], 4294967168 }
  0xe6   :  { %130 = vsyncpa [#allocation3], 1 }
  0xe7   :  { %131 = vsyncpa [#allocation6], 1 }
  0xe8   :  { %132 = vsyncpa [#allocation4], 1 }

</bundles_post_ra>
